<compile_context>
chip_gen: v5e
topology: v5e:2x2
jax: 0.10.0
libtpu: 0.0.40
codegen_flags: <defaults>
</compile_context>

<pallas_src>
import jax
import jax.numpy as jnp
from jax import lax
from jax.experimental import pallas as pl
from jax.experimental.pallas import tpu as pltpu


def _round_up(v: int, m: int) -> int:
    return ((v + m - 1) // m) * m


def _vector_linear_kernel(x_ref, w_ref, o_ref):
    # x_ref: (TM, c_in)   flattened vector-feature rows (one M tile)
    # w_ref: (c_out, c_in) PyTorch nn.Linear weight, resident across the grid
    # o_ref: (TM, c_out)
    o_ref[...] = lax.dot_general(
        x_ref[...],
        w_ref[...],
        dimension_numbers=(((1,), (1,)), ((), ())),   # contract c_in with c_in
        preferred_element_type=jnp.float32,
    ).astype(o_ref.dtype)


def vector_linear(x: jax.Array, weight: jax.Array, *, tile_m: int = 1024) -> jax.Array:
    """Apply VectorLinear.

    x:      (N, in_features, D)
    weight: (out_features, in_features)   (PyTorch nn.Linear weight layout)
    returns (N, out_features, D)
    """
    N, c_in, D = x.shape
    c_out, c_in_w = weight.shape
    assert c_in == c_in_w

    dtype = x.dtype
    itemsize = jnp.dtype(dtype).itemsize
    sublane = max(8, 32 // itemsize)          # 8 for f32, 16 for bf16, ...

    # Glue: put the contraction axis last -> plain (M, K) matmul.
    M = N * D
    x2 = jnp.transpose(x, (0, 2, 1)).reshape(M, c_in)        # (M, c_in)

    # Tile size: large enough to hit the HBM roofline, but never bigger than
    # the (sublane-rounded) problem.  Pad M once so every tile is full.
    tm = min(tile_m, _round_up(M, sublane))
    m_pad = _round_up(M, tm)
    if m_pad > M:
        x2 = jnp.pad(x2, ((0, m_pad - M), (0, 0)))

    grid = (m_pad // tm,)

    flops = 2 * m_pad * c_in * c_out
    bytes_accessed = itemsize * (m_pad * c_in + c_out * c_in + m_pad * c_out)

    out2 = pl.pallas_call(
        _vector_linear_kernel,
        out_shape=jax.ShapeDtypeStruct((m_pad, c_out), dtype),
        grid=grid,
        in_specs=[
            # x tile: marches down M, double-buffered by Pallas.
            pl.BlockSpec((tm, c_in), lambda i: (i, 0)),
            # weight: same block every step -> stays resident in VMEM.
            pl.BlockSpec((c_out, c_in), lambda i: (0, 0)),
        ],
        out_specs=pl.BlockSpec((tm, c_out), lambda i: (i, 0)),
        compiler_params=pltpu.CompilerParams(
            dimension_semantics=("parallel",),     # megacore-shardable on v7x
        ),
        cost_estimate=pl.CostEstimate(
            flops=flops, transcendentals=0, bytes_accessed=bytes_accessed
        ),
    )(x2, weight)

    # Glue: strip padding, back to (N, out_features, D).
    out2 = out2[:M].reshape(N, D, c_out)
    return jnp.transpose(out2, (0, 2, 1))


if __name__ == "__main__":
    key = jax.random.PRNGKey(0)
    k_x, k_w = jax.random.split(key)

    # Small shapes consistent with PaiNN vector features: (atoms, channels, 3)
    n_atoms, in_features, out_features, D = 8, 32, 32, 3

    x = jax.random.normal(k_x, (n_atoms, in_features, D), dtype=jnp.float32)

    # Deterministic nn.Linear(bias=False) style init: U(-1/sqrt(in), 1/sqrt(in))
    bound = 1.0 / (in_features ** 0.5)
    weight = jax.random.uniform(
        k_w, (out_features, in_features), dtype=jnp.float32,
        minval=-bound, maxval=bound,
    )

    out = vector_linear(x, weight)
    out = jax.block_until_ready(out)

    # Reference check (pure JAX): out[n, o, d] = sum_i W[o, i] * x[n, i, d]
    ref = jnp.einsum("oi,nid->nod", weight, x)
    assert out.shape == (n_atoms, out_features, D)
    assert jnp.allclose(out, ref, atol=1e-5, rtol=1e-5)

    print("KERNEL_OK")
</pallas_src>

<mosaic_0001>
module attributes {stable_mosaic.version = 11 : i64} {
  func.func @_vector_linear_kernel(%arg0: i32, %arg1: memref<24x32xf32, #tpu.memory_space<vmem>>, %arg2: memref<32x32xf32, #tpu.memory_space<vmem>>, %arg3: memref<24x32xf32, #tpu.memory_space<vmem>>) attributes {dimension_semantics = [#tpu.dimension_semantics<parallel>], iteration_bounds = array<i64: 1>, scalar_prefetch = 0 : i64, scratch_operands = 0 : i64, tpu.core_type = #tpu.core_type<tc>, window_params = [{transform_indices = @transform_0, window_bounds = array<i64: 24, 32>}, {pipeline_mode = #tpu.pipeline_mode<synchronous>, transform_indices = @transform_1, window_bounds = array<i64: 32, 32>}, {transform_indices = @transform_2, window_bounds = array<i64: 24, 32>}]} {
    %c0 = arith.constant 0 : index
    %c0_0 = arith.constant 0 : index
    %0 = vector.load %arg1[%c0, %c0_0] : memref<24x32xf32, #tpu.memory_space<vmem>>, vector<24x32xf32>
    %c0_1 = arith.constant 0 : index
    %c0_2 = arith.constant 0 : index
    %1 = vector.load %arg2[%c0_1, %c0_2] : memref<32x32xf32, #tpu.memory_space<vmem>>, vector<32x32xf32>
    %cst = arith.constant dense<0.000000e+00> : vector<24x32xf32>
    %2 = tpu.matmul %0, %1, %cst {dimension_numbers = #tpu.dot_dimension_numbers<[1], [1], [0], [0], [0, 0, 1, 0], [], []>} : vector<24x32xf32>, vector<32x32xf32>, vector<24x32xf32> -> vector<24x32xf32>
    %c0_3 = arith.constant 0 : index
    %c0_4 = arith.constant 0 : index
    %3 = vector.load %arg3[%c0_3, %c0_4] : memref<24x32xf32, #tpu.memory_space<vmem>>, vector<24x32xf32>
    tpu.vector_store %arg3[%c0_3, %c0_4], %2 {strides = array<i32>} : memref<24x32xf32, #tpu.memory_space<vmem>>, vector<24x32xf32>,
    return
  }
  func.func @transform_0(%arg0: i32) -> (i32, i32) {
    %c0_i32 = arith.constant 0 : i32
    %c0_i32_0 = arith.constant 0 : i32
    return %arg0, %c0_i32 : i32, i32
  }
  func.func @transform_1(%arg0: i32) -> (i32, i32) {
    %c0_i32 = arith.constant 0 : i32
    %c0_i32_0 = arith.constant 0 : i32
    %c0_i32_1 = arith.constant 0 : i32
    return %c0_i32, %c0_i32_0 : i32, i32
  }
  func.func @transform_2(%arg0: i32) -> (i32, i32) {
    %c0_i32 = arith.constant 0 : i32
    %c0_i32_0 = arith.constant 0 : i32
    return %arg0, %c0_i32 : i32, i32
  }
}

</mosaic_0001>

<bundles_post_ra>
// kernel: tpu_custom_call.1
= control target key start
LH: loop header
LB: loop body
LE: loop exit
PB: predicated region body
PF: predicated region fallthrough
CT: control target
= control target key end

     0   :  { %7 = vsyncpa [#allocation3], 0  ;;  %s276_s0 = inlined_call_operand.hbm [shape: f32[24,32], index: 0, kind: input, shape index: {}]   ;;  %s277_s1 = inlined_call_operand.hbm [shape: f32[32,32], index: 1, kind: input, shape index: {}]   ;;  %s278_s2 = inlined_call_operand.hbm [shape: f32[24,32], index: 2, kind: output, shape index: {}]  }
   0x1   :  { %8 = vsyncpa [#allocation6], 0 }
   0x2   :  { %9 = vsyncpa [#allocation4], 0  ;;  %s14_s11 = sshll.u32 %s276_s0, 4  ;;  %s220_s12 = smov [#allocation2]   ;;  %s15_s11 = int_to_ptr.hbm [resolvable:$true] %s14_s11 }
   0x3   :  { %s16_s13 = sshll.u32 %s220_s12, 4  ;;  %s27_s16 = sshll.u32 %s277_s1, 4  ;;  %s17_s13 = int_to_ptr.vmem [resolvable:$true] %s16_s13  ;;  %s28_s16 = int_to_ptr.hbm [resolvable:$true] %s27_s16 }
   0x4   :  { %s221_s17 = smov 128   ;;  %s222_s18 = smov 8  }
   0x5   :  { %22 = dma.hbm_to_vmem [thread:$0]  %s15_s11, 384, %s17_s13, [#allocation3], %s221_s17, %s221_s17, %s222_s18  }
   0x6   :  { %s223_s19 = smov [#allocation5]  }
   0x7   :  { %s29_s20 = sshll.u32 %s223_s19, 4  ;;  %s30_s20 = int_to_ptr.vmem [resolvable:$true] %s29_s20 }
   0x8   :  { %35 = dma.hbm_to_vmem [thread:$0]  %s28_s16, 512, %s30_s20, [#allocation6], %s221_s17, %s221_s17, %s222_s18  }
   0x9   :  { %214 = dma.done.wait [#allocation3], 384  }
   0xa   :  { %215 = vsyncadd [#allocation3], 4294966912 }
   0xb   :  { %216 = dma.done.wait [#allocation6], 512  }
   0xc   :  { %217 = vsyncadd [#allocation6], 4294966784  ;;  %vm51_vm0 = vcmask 261120   ;;  %v50_v0 = vld [vmem:[#allocation5 + $0x18] sm:$0xff]  ;;  %v49_v1 = vld [vmem:[#allocation5 + $0x10] sm:$0xff]  ;;  %s224_s0 = smov [#allocation7]  }
   0xd   :  { %130 = vmatpush.xpose.msk.msra.mxu2 %vm51_vm0, %v50_v0  ;;  %122 = vmatpush.xpose.msk.msra.mxu0 %vm51_vm0, %v50_v0  ;;  %v48_v2 = vld [vmem:[#allocation5 + $0x8] sm:$0xff]  ;;  %v47_v3 = vld [vmem:[#allocation5] sm:$0xff]  ;;  %v46_v4 = vld [vmem:[#allocation2 + $0x10] sm:$0xff]  ;;  %s106_s1 = sshll.u32 %s224_s0, 4  ;;  %s108_s23 = sshll.u32 %s278_s2, 4  ;;  %s107_s1 = int_to_ptr.vmem [resolvable:$true] %s106_s1  ;;  %s109_s23 = int_to_ptr.hbm [resolvable:$true] %s108_s23 }
   0xe   :  { %129 = vmatpush.xpose.msk.msra.mxu1 %vm51_vm0, %v50_v0  ;;  %v44_v5 = vld [vmem:[#allocation2] sm:$0xff]  ;;  %v45_v6 = vld [vmem:[#allocation2 + $0x8] sm:$0xff] }
  0x11   :  { %132 = vmatpush.xpose.msk.msra.mxu2 %vm51_vm0, %v49_v1  ;;  %123 = vmatpush.xpose.msk.msra.mxu0 %vm51_vm0, %v49_v1 }
  0x12   :  { %131 = vmatpush.xpose.msk.msra.mxu1 %vm51_vm0, %v49_v1 }
  0x15   :  { %134 = vmatpush.xpose.msk.msra.mxu2 %vm51_vm0, %v48_v2  ;;  %124 = vmatpush.xpose.msk.msra.mxu0 %vm51_vm0, %v48_v2 }
  0x16   :  { %133 = vmatpush.xpose.msk.msra.mxu1 %vm51_vm0, %v48_v2 }
  0x19   :  { %136 = vmatpush.xpose.msk.msra.mxu2 %vm51_vm0, %v47_v3  ;;  %125 = vmatpush.xpose.msk.msra.mxu0 %vm51_vm0, %v47_v3 }
  0x1a   :  { %135 = vmatpush.xpose.msk.msra.mxu1 %vm51_vm0, %v47_v3 }
  0x1c   :  { %128 = vmatmul.msk.f32.vlgmr.msra.gmra.mxu2 %vm51_vm0, %v46_v4  ;;  %126 = vmatmul.msk.f32.vlgmr.msra.gmra.mxu0 %vm51_vm0, %v44_v5 }
  0x1d   :  { %127 = vmatmul.msk.f32.vlgmr.msra.gmra.mxu1 %vm51_vm0, %v45_v6 }
  0x99   :  { %v90_v7 = vpop.f32.mrf.mxu0 }
  0x9a   :  { %99 = vst.msk [vmem:[#allocation7] sm:$0xff] %vm51_vm0, %v90_v7  ;;  %v93_v8 = vpop.f32.mrf.mxu1 }
  0x9b   :  { %100 = vst.msk [vmem:[#allocation7 + $0x8] sm:$0xff] %vm51_vm0, %v93_v8 }
  0x9f   :  { %v96_v9 = vpop.f32.mrf.mxu2 }
  0xa0   :  { %101 = vst.msk [vmem:[#allocation7 + $0x10] sm:$0xff] %vm51_vm0, %v96_v9 }
  0xa1   :  { %114 = dma.vmem_to_hbm [thread:$0]  %s107_s1, 384, %s109_s23, [#allocation4], %s221_s17, %s221_s17, %s222_s18  }
  0xa2   :  { %218 = dma.done.wait [#allocation4], 384  }
  0xa3   :  { %219 = vsyncadd [#allocation4], 4294966912 }
  0xa4   :  { %119 = vsyncpa [#allocation3], 1 }
  0xa5   :  { %120 = vsyncpa [#allocation6], 1 }
  0xa6   :  { %121 = vsyncpa [#allocation4], 1 }

</bundles_post_ra>
